<compile_context>
chip_gen: v7x
topology: tpu7x:2x2x1
jax: 0.10.0
libtpu: 0.0.40
codegen_flags: <defaults>
</compile_context>

<pallas_src>
import jax
import jax.numpy as jnp
from jax.experimental import pallas as pl
from jax.experimental.pallas import tpu as pltpu


_LANE_CANDIDATES = (16384, 8192, 4096, 2048, 1024, 512, 256, 128)
# ~2 MiB per block: input + output blocks, each double-buffered => ~8 MiB live
# VMEM, comfortably under every generation's scoped-VMEM default.
_TARGET_BLOCK_BYTES = 2 * 1024 * 1024


def _relu_kernel(x_ref, o_ref):
    # Elementwise hot path: ReLU on the whole VMEM tile (VPU).
    o_ref[...] = jnp.maximum(x_ref[...], jnp.zeros((), x_ref.dtype))


def _relu_2d(x2d):
    """Run the Pallas ReLU kernel over a lane-dense 2D array (rows, cols)."""
    R, C = x2d.shape
    itemsize = jnp.dtype(x2d.dtype).itemsize

    # Rows per block so that one block is ~_TARGET_BLOCK_BYTES.
    tr = max(1, _TARGET_BLOCK_BYTES // (C * itemsize))
    if tr >= R:
        tr = R  # whole array in one block: always a legal block shape
    else:
        # Keep partial tiles aligned to the sublane packing granularity
        # (8 for f32, 16 for bf16, 32 for int8).
        sub = 8 * max(1, 4 // itemsize)
        tr = max(sub, (tr // sub) * sub)

    grid = (pl.cdiv(R, tr),)  # ragged last block handled by Pallas masking

    return pl.pallas_call(
        _relu_kernel,
        out_shape=jax.ShapeDtypeStruct((R, C), x2d.dtype),
        grid_spec=pltpu.PrefetchScalarGridSpec(
            num_scalar_prefetch=0,
            grid=grid,
            in_specs=[pl.BlockSpec((tr, C), lambda i: (i, 0))],
            out_specs=pl.BlockSpec((tr, C), lambda i: (i, 0)),
        ),
        input_output_aliases={0: 0},
        compiler_params=pltpu.CompilerParams(
            dimension_semantics=("parallel",),
        ),
    )(x2d)


def _pick_lane_width(total):
    for lane in _LANE_CANDIDATES:
        if total % lane == 0:
            return lane
    return None


def stage4_forward(input0):
    """Equivalent of Stage4.forward: out = ReLU(input0.clone()).

    input0: NCHW float array. Returns a new array of the same shape/dtype;
    input0 itself is left untouched (matches clone() + inplace ReLU).
    """
    shape = input0.shape
    total = 1
    for d in shape:
        total *= d
    flat = input0.reshape(total)

    lane = _pick_lane_width(total)
    if lane is not None:
        # Common case (conv feature-map totals are multiples of 128):
        # pad-free, lane-dense slab.
        y2d = _relu_2d(flat.reshape(total // lane, lane))
        return y2d.reshape(shape)

    # Rare fallback: total not divisible by 128 -> pad the flat vector once.
    lane = 512
    padded = pl.cdiv(total, lane) * lane
    flat_p = jnp.pad(flat, (0, padded - total))
    y2d = _relu_2d(flat_p.reshape(padded // lane, lane))
    return y2d.reshape(-1)[:total].reshape(shape)


if __name__ == "__main__":
    # Stage4 has no parameters (just ReLU), so nothing to initialize.
    key = jax.random.PRNGKey(0)
    x = jax.random.normal(key, (2, 4, 16, 16), dtype=jnp.float32)

    y = stage4_forward(x)
    jax.block_until_ready(y)

    # sanity check against pure-JAX reference
    ref = jnp.maximum(x, 0.0)
    assert y.shape == x.shape and y.dtype == x.dtype
    assert jnp.allclose(y, ref), "mismatch vs reference ReLU"
    # input must be untouched (clone semantics): it still has negative entries
    assert bool(jnp.any(x < 0)), "input was mutated in place"

    print("KERNEL_OK")
</pallas_src>

<mosaic_0001>
module attributes {stable_mosaic.version = 11 : i64} {
  func.func @_relu_kernel(%arg0: i32, %arg1: memref<1x2048xf32, #tpu.memory_space<vmem>>, %arg2: memref<1x2048xf32, #tpu.memory_space<vmem>>) attributes {dimension_semantics = [#tpu.dimension_semantics<parallel>], iteration_bounds = array<i64: 1>, scalar_prefetch = 0 : i64, scratch_operands = 0 : i64, tpu.core_type = #tpu.core_type<tc>, window_params = [{transform_indices = @transform_0, window_bounds = array<i64: 1, 2048>}, {transform_indices = @transform_1, window_bounds = array<i64: 1, 2048>}]} {
    %c0 = arith.constant 0 : index
    %c0_0 = arith.constant 0 : index
    %0 = vector.load %arg1[%c0, %c0_0] : memref<1x2048xf32, #tpu.memory_space<vmem>>, vector<1x2048xf32>
    %cst = arith.constant 0.000000e+00 : f32
    %1 = vector.broadcast %cst : f32 to vector<1x2048xf32>
    %2 = arith.maximumf %0, %1 : vector<1x2048xf32>
    %c0_1 = arith.constant 0 : index
    %c0_2 = arith.constant 0 : index
    %3 = vector.load %arg2[%c0_1, %c0_2] : memref<1x2048xf32, #tpu.memory_space<vmem>>, vector<1x2048xf32>
    tpu.vector_store %arg2[%c0_1, %c0_2], %2 {strides = array<i32>} : memref<1x2048xf32, #tpu.memory_space<vmem>>, vector<1x2048xf32>,
    return
  }
  func.func @transform_0(%arg0: i32) -> (i32, i32) {
    %c0_i32 = arith.constant 0 : i32
    %c0_i32_0 = arith.constant 0 : i32
    return %arg0, %c0_i32 : i32, i32
  }
  func.func @transform_1(%arg0: i32) -> (i32, i32) {
    %c0_i32 = arith.constant 0 : i32
    %c0_i32_0 = arith.constant 0 : i32
    return %arg0, %c0_i32 : i32, i32
  }
}

</mosaic_0001>

<bundles_post_ra>
// kernel: tpu_custom_call.1
= control target key start
LH: loop header
LB: loop body
LE: loop exit
PB: predicated region body
PF: predicated region fallthrough
CT: control target
= control target key end

     0   :  { %6 = vsyncpa [#allocation3], 0  ;;  %s128_s0 = inlined_call_operand.hbm [shape: f32[1,2048], index: 0, kind: input, shape index: {}, may-alias: {0,1}]   ;;  %s129_s1 = inlined_call_operand.hbm [shape: f32[1,2048], index: 1, kind: output, shape index: {}, may-alias: {0,1}]  }
   0x1   :  { %7 = vsyncpa [#allocation4], 0  ;;  %s92_s6 = smov [#allocation2]   ;;  %s44_s10 = scalar_lea.hbm %s128_s0, 256 }
   0x2   :  { %s14_s7 = sshll.u32 %s92_s6, 4  ;;  %p45_p0 = scmp.ne.s32.totalorder %s128_s0, %s44_s10  ;;  %s15_s7 = int_to_ptr.vmem [resolvable:$true] %s14_s7 }
   0x3   :  { %p48_p1 = scmp.lt.u32.totalorder %s44_s10, %s128_s0 }
   0x5   :  { %p50_p2 = pnand %p48_p1, %p45_p0 }
   0x7   :  { %53 = shalt.err (!%p50_p2)
}
   0x8   :  { %s54_s15 = scalar_lea.vmem %s15_s7, 256  ;;  %p59_p4 = scmp.lt.s32.totalorder %s15_s7, %s15_s7 }
   0x9   :  { %p55_p3 = scmp.ne.s32.totalorder %s15_s7, %s54_s15  ;;  %p60_p5 = scmp.lt.s32.totalorder %s54_s15, %s54_s15 }
   0xb   :  { %p61_p6 = por %p60_p5, %p59_p4 }
   0xd   :  { %p62_p7 = pnand %p61_p6, %p55_p3 }
   0xf   :  { %65 = shalt.err (!%p62_p7)
}
  0x10   :  { %17 = dma.hbm_to_vmem [thread:$0]  %s128_s0, 256, %s15_s7, [#allocation3]  }
  0x11   :  { %88 = dma.done.wait [#allocation3], 256  }
  0x12   :  { %89 = vsyncadd [#allocation3], 4294967040  ;;  %s93_s18 = smov [#allocation5]   ;;  %v21_v0 = vld [vmem:[#allocation2] sm:$0xff]  ;;  %v22_v1 = vld [vmem:[#allocation2 + $0x8] sm:$0xff] }
  0x13   :  { %s33_s19 = sshll.u32 %s93_s18, 4  ;;  %v23_v2 = vmax.f32 %v21_v0, 0.0  ;;  %v24_v3 = vmax.f32 %v22_v1, 0.0  ;;  %s34_s19 = int_to_ptr.vmem [resolvable:$true] %s33_s19 }
  0x14   :  { %s66_s20 = scalar_lea.vmem %s34_s19, 256  ;;  %p71_p9 = scmp.lt.s32.totalorder %s34_s19, %s34_s19 }
  0x15   :  { %25 = vst [vmem:[#allocation5] sm:$0xff] %v23_v2  ;;  %26 = vst [vmem:[#allocation5 + $0x8] sm:$0xff] %v24_v3  ;;  %p67_p8 = scmp.ne.s32.totalorder %s34_s19, %s66_s20  ;;  %p72_p10 = scmp.lt.s32.totalorder %s66_s20, %s66_s20 }
  0x17   :  { %p73_p11 = por %p72_p10, %p71_p9 }
  0x19   :  { %p74_p12 = pnand %p73_p11, %p67_p8 }
  0x1b   :  { %77 = shalt.err (!%p74_p12)
}
  0x1c   :  { %s78_s22 = scalar_lea.hbm %s129_s1, 256 }
  0x1d   :  { %p79_p13 = scmp.ne.s32.totalorder %s129_s1, %s78_s22  ;;  %p82_p0 = scmp.lt.u32.totalorder %s78_s22, %s129_s1 }
  0x1f   :  { %p84_p1 = pnand %p82_p0, %p79_p13 }
  0x21   :  { %87 = shalt.err (!%p84_p1)
}
  0x22   :  { %36 = dma.vmem_to_hbm [thread:$0]  %s34_s19, 256, %s129_s1, [#allocation4]  }
  0x23   :  { %90 = dma.done.wait [#allocation4], 256  }
  0x24   :  { %91 = vsyncadd [#allocation4], 4294967040 }
  0x25   :  { %40 = vsyncpa [#allocation3], 1 }
  0x26   :  { %41 = vsyncpa [#allocation4], 1 }

</bundles_post_ra>
